<compile_context>
chip_gen: v6e
topology: v6e:2x2x1
jax: 0.10.0
libtpu: 0.0.40
codegen_flags: <defaults>
</compile_context>

<pallas_src>
import math
import functools

import jax
import jax.numpy as jnp
from jax import lax
from jax.experimental import pallas as pl
from jax.experimental.pallas import tpu as pltpu


# ---------------------------------------------------------------------------
# Kernel
# ---------------------------------------------------------------------------
def _attn_kernel(x_ref, w_ref, b_ref, o_ref, qkv_ref, *,
                 heads_per_group, head_dim, exp_dtype):
    """One (batch-block, head-group) tile per grid step.

    x_ref   : (TB, S, H)      bf16 VMEM   hidden states
    w_ref   : (H, 3*Hg)       bf16 VMEM   [Wq_g | Wk_g | Wv_g]  (scale folded into Wq)
    b_ref   : (1, 3*Hg)       f32  VMEM   [bq_g | bk_g | bv_g]
    o_ref   : (TB, S, Hg)          VMEM   this group's context output
    qkv_ref : (TB, S, 3*Hg)   bf16 VMEM   scratch: post-bias projections
    """
    TB, S, H = x_ref.shape
    dh = head_dim
    gh = heads_per_group
    Hg = gh * dh

    # Fused QKV projection for this head group: one MXU pass, f32 accumulation
    # + f32 bias, materialized ONCE as bf16 scratch (no live f32 qkv value).
    x2d = x_ref[...].reshape(TB * S, H)
    proj = jnp.dot(x2d, w_ref[...], preferred_element_type=jnp.float32) + b_ref[0]
    qkv_ref[...] = proj.astype(jnp.bfloat16).reshape(TB, S, 3 * Hg)

    def per_batch(b, carry):
        ctx = []
        for h in range(gh):                              # gh is small (1-2 typical)
            c0 = h * dh
            qh = qkv_ref[b, :, c0:c0 + dh]                      # (S, dh) bf16
            kh = qkv_ref[b, :, Hg + c0:Hg + c0 + dh]            # (S, dh) bf16
            vh = qkv_ref[b, :, 2 * Hg + c0:2 * Hg + c0 + dh]    # (S, dh) bf16

            # scores = (q / sqrt(dh)) @ k^T on the MXU, f32 accumulation.
            s = lax.dot_general(qh, kh, (((1,), (1,)), ((), ())),
                                preferred_element_type=jnp.float32)

            # Numerically stable softmax; exp in bf16 on v6e/v7x, f32 on v5e.
            # Row max / sum stay f32; denominator via approx EUP reciprocal.
            m = jnp.max(s, axis=-1, keepdims=True)
            e = jnp.exp((s - m).astype(exp_dtype))
            denom = jnp.sum(e, axis=-1, keepdims=True, dtype=jnp.float32)
            inv = pl.reciprocal(denom, approx=True)
            p = (e * inv.astype(e.dtype)).astype(jnp.bfloat16)
            # TODO(synk): training-mode attention-probs dropout / head_mask not
            # implemented (identity, as in eval-mode forward).

            ctx.append(jnp.dot(p, vh, preferred_element_type=jnp.float32))

        # Merge this group's heads and store once, lane-dense (Hg % 128 == 0
        # whenever more than one group exists).
        merged = ctx[0] if gh == 1 else jnp.concatenate(ctx, axis=-1)
        o_ref[b] = merged.astype(o_ref.dtype)
        return carry

    if TB == 1:
        per_batch(0, 0)
    else:
        lax.fori_loop(0, TB, per_batch, 0, unroll=True)


# ---------------------------------------------------------------------------
# Wrapper helpers
# ---------------------------------------------------------------------------
def _pick_heads_per_group(num_heads, head_dim):
    """Smallest divisor gh of num_heads with gh*head_dim a multiple of 128
    lanes (aligned q/k/v columns, unmasked output stores); otherwise fall back
    to a single group (block width == full H, always legal)."""
    for gh in range(1, num_heads + 1):
        if num_heads % gh == 0 and (gh * head_dim) % 128 == 0:
            return gh
    return num_heads


def _pick_batch_block(B, S, n_groups, target_rows=256, max_tb=8):
    """Pack batch elements so the projection has ~target_rows MXU rows, bound
    the in-kernel unroll, keep >= 2 grid steps when possible, and avoid
    misaligned reshapes when S % 8 != 0."""
    tb = max(1, min(B, max(1, target_rows // max(S, 1)), max_tb))
    if S % 8 != 0:
        tb = 1
    if n_groups == 1 and B >= 2:
        tb = min(tb, max(1, B // 2))
    while B % tb != 0:
        tb -= 1
    return tb


def _tpu_device_kind():
    try:
        return jax.devices()[0].device_kind.lower()
    except Exception:
        return ""


def _vmem_limit_bytes():
    """~75% of physical VMEM (headroom for compiler spill / internal scratch);
    falls back to 48 MiB, which is safe on v7x's 64 MiB as well as v5e/v6e."""
    cap = None
    try:
        info = pltpu.get_tpu_info()
        for attr in ("vmem_capacity_bytes", "vmem_size_bytes", "vmem_bytes"):
            cap = getattr(info, attr, None)
            if cap:
                break
    except Exception:
        cap = None
    if not cap:
        cap = 64 * 1024 * 1024
    return int(cap) * 3 // 4


def _softmax_exp_dtype():
    # bf16 EUP/VPU paths exist on v6e / v7x; keep f32 on v5e and older/unknown.
    kind = _tpu_device_kind()
    if any(tag in kind for tag in ("v6", "v7", "7x")):
        return jnp.bfloat16
    return jnp.float32


# ---------------------------------------------------------------------------
# Public entry point
# ---------------------------------------------------------------------------
def vit_self_attention(hidden_states, wq, bq, wk, bk, wv, bv, *, num_heads):
    """Forward of BetterViTSelfAttention (eval mode).

    hidden_states: (B, S, H); weights are (H_in, H_out) == nn.Linear.weight.T;
    biases are (H,).  Returns the context layer (B, S, H).
    """
    B, S, H = hidden_states.shape
    assert H % num_heads == 0
    dh = H // num_heads

    gh = _pick_heads_per_group(num_heads, dh)
    n_groups = num_heads // gh
    Hg = gh * dh

    # ---- one-time (trace-level) parameter prep ------------------------------
    # Fold 1/sqrt(dh) into Wq / bq (free), then lay the fused weight out as
    # per-head-group column blocks [Wq_g | Wk_g | Wv_g] so each grid step only
    # streams its own group's columns.  bf16 operands feed the MXU; the bias
    # stays f32 and is added after the f32-accumulated matmul.
    scale = 1.0 / math.sqrt(dh)
    wqs, bqs = wq * scale, bq * scale

    def _wgrp(w):  # (H, H) -> (H, n_groups, Hg), heads are column-major blocks
        return w.reshape(H, n_groups, Hg)

    def _bgrp(b):  # (H,) -> (n_groups, Hg)
        return b.reshape(n_groups, Hg)

    w_fused = jnp.concatenate([_wgrp(wqs), _wgrp(wk), _wgrp(wv)], axis=2)
    w_fused = w_fused.reshape(H, n_groups * 3 * Hg).astype(jnp.bfloat16)
    b_fused = jnp.concatenate([_bgrp(bqs), _bgrp(bk), _bgrp(bv)], axis=1)
    b_fused = b_fused.reshape(1, n_groups * 3 * Hg).astype(jnp.float32)

    x_bf16 = hidden_states.astype(jnp.bfloat16)

    tb = _pick_batch_block(B, S, n_groups)
    grid = (B // tb, n_groups)   # head-group axis innermost: x block stays resident

    kernel = functools.partial(_attn_kernel, heads_per_group=gh, head_dim=dh,
                               exp_dtype=_softmax_exp_dtype())

    return pl.pallas_call(
        kernel,
        out_shape=jax.ShapeDtypeStruct((B, S, H), hidden_states.dtype),
        grid_spec=pltpu.PrefetchScalarGridSpec(
            num_scalar_prefetch=0,
            grid=grid,
            in_specs=[
                pl.BlockSpec((tb, S, H), lambda i, g: (i, 0, 0)),
                pl.BlockSpec((H, 3 * Hg), lambda i, g: (0, g)),
                pl.BlockSpec((1, 3 * Hg), lambda i, g: (0, g)),
            ],
            out_specs=pl.BlockSpec((tb, S, Hg), lambda i, g: (i, 0, g)),
            scratch_shapes=[pltpu.VMEM((tb, S, 3 * Hg), jnp.bfloat16)],
        ),
        compiler_params=pltpu.CompilerParams(
            dimension_semantics=("parallel", "parallel"),
            vmem_limit_bytes=_vmem_limit_bytes(),
        ),
    )(x_bf16, w_fused, b_fused)


# ---------------------------------------------------------------------------
# Pure-JAX reference (same intended mixed precision as the kernel)
# ---------------------------------------------------------------------------
def _reference(hidden_states, wq, bq, wk, bk, wv, bv, *, num_heads):
    B, S, H = hidden_states.shape
    dh = H // num_heads
    scale = 1.0 / math.sqrt(dh)

    x = hidden_states.astype(jnp.bfloat16)
    wqkv = jnp.concatenate([wq * scale, wk, wv], axis=1).astype(jnp.bfloat16)
    bqkv = jnp.concatenate([bq * scale, bk, bv]).astype(jnp.float32)

    qkv = jnp.einsum('bsh,hf->bsf', x, wqkv,
                     preferred_element_type=jnp.float32) + bqkv
    q, k, v = qkv[..., :H], qkv[..., H:2 * H], qkv[..., 2 * H:]

    def split(t):  # (B,S,H) -> (B,nh,S,dh)
        return t.reshape(B, S, num_heads, dh).transpose(0, 2, 1, 3)

    qh = split(q).astype(jnp.bfloat16)
    kh = split(k).astype(jnp.bfloat16)
    vh = split(v).astype(jnp.bfloat16)

    scores = jnp.einsum('bhqd,bhkd->bhqk', qh, kh,
                        preferred_element_type=jnp.float32)
    probs = jax.nn.softmax(scores, axis=-1)
    ctx = jnp.einsum('bhqk,bhkd->bhqd', probs.astype(jnp.bfloat16), vh,
                     preferred_element_type=jnp.float32)
    ctx = ctx.transpose(0, 2, 1, 3).reshape(B, S, H)
    return ctx.astype(hidden_states.dtype)


# ---------------------------------------------------------------------------
# Self-test
# ---------------------------------------------------------------------------
def _run_case(key, B, S, H, NH, label):
    kx, kq, kbq, kk, kbk, kv, kbv = jax.random.split(key, 7)
    x = jax.random.normal(kx, (B, S, H), dtype=jnp.float32)
    # nn.Linear(H, H, bias=True) parameters, stored as (in, out) == W.T.
    wq = jax.random.normal(kq, (H, H), dtype=jnp.float32) * 0.05
    bq = jax.random.normal(kbq, (H,), dtype=jnp.float32) * 0.05
    wk = jax.random.normal(kk, (H, H), dtype=jnp.float32) * 0.05
    bk = jax.random.normal(kbk, (H,), dtype=jnp.float32) * 0.05
    wv = jax.random.normal(kv, (H, H), dtype=jnp.float32) * 0.05
    bv = jax.random.normal(kbv, (H,), dtype=jnp.float32) * 0.05

    out = vit_self_attention(x, wq, bq, wk, bk, wv, bv, num_heads=NH)
    out = jax.block_until_ready(out)
    assert out.shape == (B, S, H)

    ref = _reference(x, wq, bq, wk, bk, wv, bv, num_heads=NH)
    err = jnp.max(jnp.abs(out - ref))
    assert jnp.allclose(out, ref, atol=2e-2, rtol=2e-2), \
        f"{label}: max abs err vs bf16-precision reference = {err}"


if __name__ == "__main__":
    key = jax.random.PRNGKey(0)
    k1, k2 = jax.random.split(key)
    # Small ViT-like config (hidden=32, heads=4, seq=8, batch=2): single-group path.
    _run_case(k1, B=2, S=8, H=32, NH=4, label="cfg1")
    # head_dim=64 config: exercises the 128-lane head-pair / multi-group grid path.
    _run_case(k2, B=2, S=16, H=256, NH=4, label="cfg2")
    print("KERNEL_OK")
</pallas_src>

<mosaic_0001>
module attributes {stable_mosaic.version = 11 : i64} {
  func.func @_attn_kernel(%arg0: i32, %arg1: i32, %arg2: memref<1x8x32xbf16, #tpu.memory_space<vmem>>, %arg3: memref<32x96xbf16, #tpu.memory_space<vmem>>, %arg4: memref<1x96xf32, #tpu.memory_space<vmem>>, %arg5: memref<1x8x32xf32, #tpu.memory_space<vmem>>, %arg6: memref<1x8x96xbf16, #tpu.memory_space<vmem>>) attributes {dimension_semantics = [#tpu.dimension_semantics<parallel>, #tpu.dimension_semantics<parallel>], iteration_bounds = array<i64: 2, 1>, scalar_prefetch = 0 : i64, scratch_operands = 1 : i64, tpu.core_type = #tpu.core_type<tc>, window_params = [{transform_indices = @transform_0, window_bounds = array<i64: 1, 8, 32>}, {transform_indices = @transform_1, window_bounds = array<i64: 32, 96>}, {transform_indices = @transform_2, window_bounds = array<i64: 1, 96>}, {transform_indices = @transform_3, window_bounds = array<i64: 1, 8, 32>}]} {
    %c0 = arith.constant 0 : index
    %c0_0 = arith.constant 0 : index
    %c0_1 = arith.constant 0 : index
    %0 = vector.load %arg2[%c0, %c0_0, %c0_1] : memref<1x8x32xbf16, #tpu.memory_space<vmem>>, vector<1x8x32xbf16>
    %1 = vector.shape_cast %0 : vector<1x8x32xbf16> to vector<8x32xbf16>
    %c0_2 = arith.constant 0 : index
    %c0_3 = arith.constant 0 : index
    %2 = vector.load %arg3[%c0_2, %c0_3] : memref<32x96xbf16, #tpu.memory_space<vmem>>, vector<32x96xbf16>
    %cst = arith.constant dense<0.000000e+00> : vector<8x96xf32>
    %3 = tpu.matmul %1, %2, %cst {dimension_numbers = #tpu.dot_dimension_numbers<[1], [0], [0], [1], [0, 0, 1, 1], [], []>} : vector<8x32xbf16>, vector<32x96xbf16>, vector<8x96xf32> -> vector<8x96xf32>
    %c0_4 = arith.constant 0 : index
    %c0_5 = arith.constant 0 : index
    %4 = vector.load %arg4[%c0_4, %c0_5] : memref<1x96xf32, #tpu.memory_space<vmem>>, vector<1x96xf32>
    %5 = vector.shape_cast %4 : vector<1x96xf32> to vector<96xf32>
    %6 = vector.shape_cast %5 : vector<96xf32> to vector<1x96xf32>
    %7 = vector.broadcast %6 : vector<1x96xf32> to vector<8x96xf32>
    %8 = arith.addf %3, %7 : vector<8x96xf32>
    %9 = arith.truncf %8 : vector<8x96xf32> to vector<8x96xbf16>
    %10 = vector.shape_cast %9 : vector<8x96xbf16> to vector<1x8x96xbf16>
    %c0_6 = arith.constant 0 : index
    %c0_7 = arith.constant 0 : index
    %c0_8 = arith.constant 0 : index
    %11 = vector.load %arg6[%c0_6, %c0_7, %c0_8] : memref<1x8x96xbf16, #tpu.memory_space<vmem>>, vector<1x8x96xbf16>
    tpu.vector_store %arg6[%c0_6, %c0_7, %c0_8], %10 {strides = array<i32>} : memref<1x8x96xbf16, #tpu.memory_space<vmem>>, vector<1x8x96xbf16>,
    %c0_9 = arith.constant 0 : index
    %c0_10 = arith.constant 0 : index
    %c0_11 = arith.constant 0 : index
    %12 = vector.load %arg6[%c0_9, %c0_10, %c0_11] : memref<1x8x96xbf16, #tpu.memory_space<vmem>>, vector<1x8x8xbf16>
    %13 = vector.shape_cast %12 : vector<1x8x8xbf16> to vector<8x8xbf16>
    %c0_12 = arith.constant 0 : index
    %c0_13 = arith.constant 0 : index
    %c32 = arith.constant 32 : index
    %14 = vector.load %arg6[%c0_12, %c0_13, %c32] : memref<1x8x96xbf16, #tpu.memory_space<vmem>>, vector<1x8x8xbf16>
    %15 = vector.shape_cast %14 : vector<1x8x8xbf16> to vector<8x8xbf16>
    %c0_14 = arith.constant 0 : index
    %c0_15 = arith.constant 0 : index
    %c64 = arith.constant 64 : index
    %16 = vector.load %arg6[%c0_14, %c0_15, %c64] : memref<1x8x96xbf16, #tpu.memory_space<vmem>>, vector<1x8x8xbf16>
    %17 = vector.shape_cast %16 : vector<1x8x8xbf16> to vector<8x8xbf16>
    %cst_16 = arith.constant dense<0.000000e+00> : vector<8x8xf32>
    %18 = tpu.matmul %13, %15, %cst_16 {dimension_numbers = #tpu.dot_dimension_numbers<[1], [1], [0], [0], [0, 0, 1, 0], [], []>} : vector<8x8xbf16>, vector<8x8xbf16>, vector<8x8xf32> -> vector<8x8xf32>
    %cst_17 = arith.constant dense<0xFF800000> : vector<8xf32>
    %19 = vector.multi_reduction <maximumf>, %18, %cst_17 [1] : vector<8x8xf32> to vector<8xf32>
    %20 = vector.shape_cast %19 : vector<8xf32> to vector<8x1xf32>
    %21 = vector.broadcast %20 : vector<8x1xf32> to vector<8x8xf32>
    %22 = arith.subf %18, %21 : vector<8x8xf32>
    %23 = math.exp %22 : vector<8x8xf32>
    %cst_18 = arith.constant dense<0.000000e+00> : vector<8xf32>
    %24 = vector.multi_reduction <add>, %23, %cst_18 [1] : vector<8x8xf32> to vector<8xf32>
    %25 = vector.shape_cast %24 : vector<8xf32> to vector<8x1xf32>
    %26 = tpu.reciprocal %25 {approx = true} : vector<8x1xf32> -> vector<8x1xf32>
    %27 = vector.broadcast %26 : vector<8x1xf32> to vector<8x8xf32>
    %28 = arith.mulf %23, %27 : vector<8x8xf32>
    %29 = arith.truncf %28 : vector<8x8xf32> to vector<8x8xbf16>
    %cst_19 = arith.constant dense<0.000000e+00> : vector<8x8xf32>
    %30 = tpu.matmul %29, %17, %cst_19 {dimension_numbers = #tpu.dot_dimension_numbers<[1], [0], [0], [1], [0, 0, 1, 1], [], []>} : vector<8x8xbf16>, vector<8x8xbf16>, vector<8x8xf32> -> vector<8x8xf32>
    %c0_20 = arith.constant 0 : index
    %c0_21 = arith.constant 0 : index
    %c8 = arith.constant 8 : index
    %31 = vector.load %arg6[%c0_20, %c0_21, %c8] : memref<1x8x96xbf16, #tpu.memory_space<vmem>>, vector<1x8x8xbf16>
    %32 = vector.shape_cast %31 : vector<1x8x8xbf16> to vector<8x8xbf16>
    %c0_22 = arith.constant 0 : index
    %c0_23 = arith.constant 0 : index
    %c40 = arith.constant 40 : index
    %33 = vector.load %arg6[%c0_22, %c0_23, %c40] : memref<1x8x96xbf16, #tpu.memory_space<vmem>>, vector<1x8x8xbf16>
    %34 = vector.shape_cast %33 : vector<1x8x8xbf16> to vector<8x8xbf16>
    %c0_24 = arith.constant 0 : index
    %c0_25 = arith.constant 0 : index
    %c72 = arith.constant 72 : index
    %35 = vector.load %arg6[%c0_24, %c0_25, %c72] : memref<1x8x96xbf16, #tpu.memory_space<vmem>>, vector<1x8x8xbf16>
    %36 = vector.shape_cast %35 : vector<1x8x8xbf16> to vector<8x8xbf16>
    %cst_26 = arith.constant dense<0.000000e+00> : vector<8x8xf32>
    %37 = tpu.matmul %32, %34, %cst_26 {dimension_numbers = #tpu.dot_dimension_numbers<[1], [1], [0], [0], [0, 0, 1, 0], [], []>} : vector<8x8xbf16>, vector<8x8xbf16>, vector<8x8xf32> -> vector<8x8xf32>
    %cst_27 = arith.constant dense<0xFF800000> : vector<8xf32>
    %38 = vector.multi_reduction <maximumf>, %37, %cst_27 [1] : vector<8x8xf32> to vector<8xf32>
    %39 = vector.shape_cast %38 : vector<8xf32> to vector<8x1xf32>
    %40 = vector.broadcast %39 : vector<8x1xf32> to vector<8x8xf32>
    %41 = arith.subf %37, %40 : vector<8x8xf32>
    %42 = math.exp %41 : vector<8x8xf32>
    %cst_28 = arith.constant dense<0.000000e+00> : vector<8xf32>
    %43 = vector.multi_reduction <add>, %42, %cst_28 [1] : vector<8x8xf32> to vector<8xf32>
    %44 = vector.shape_cast %43 : vector<8xf32> to vector<8x1xf32>
    %45 = tpu.reciprocal %44 {approx = true} : vector<8x1xf32> -> vector<8x1xf32>
    %46 = vector.broadcast %45 : vector<8x1xf32> to vector<8x8xf32>
    %47 = arith.mulf %42, %46 : vector<8x8xf32>
    %48 = arith.truncf %47 : vector<8x8xf32> to vector<8x8xbf16>
    %cst_29 = arith.constant dense<0.000000e+00> : vector<8x8xf32>
    %49 = tpu.matmul %48, %36, %cst_29 {dimension_numbers = #tpu.dot_dimension_numbers<[1], [0], [0], [1], [0, 0, 1, 1], [], []>} : vector<8x8xbf16>, vector<8x8xbf16>, vector<8x8xf32> -> vector<8x8xf32>
    %c0_30 = arith.constant 0 : index
    %c0_31 = arith.constant 0 : index
    %c16 = arith.constant 16 : index
    %50 = vector.load %arg6[%c0_30, %c0_31, %c16] : memref<1x8x96xbf16, #tpu.memory_space<vmem>>, vector<1x8x8xbf16>
    %51 = vector.shape_cast %50 : vector<1x8x8xbf16> to vector<8x8xbf16>
    %c0_32 = arith.constant 0 : index
    %c0_33 = arith.constant 0 : index
    %c48 = arith.constant 48 : index
    %52 = vector.load %arg6[%c0_32, %c0_33, %c48] : memref<1x8x96xbf16, #tpu.memory_space<vmem>>, vector<1x8x8xbf16>
    %53 = vector.shape_cast %52 : vector<1x8x8xbf16> to vector<8x8xbf16>
    %c0_34 = arith.constant 0 : index
    %c0_35 = arith.constant 0 : index
    %c80 = arith.constant 80 : index
    %54 = vector.load %arg6[%c0_34, %c0_35, %c80] : memref<1x8x96xbf16, #tpu.memory_space<vmem>>, vector<1x8x8xbf16>
    %55 = vector.shape_cast %54 : vector<1x8x8xbf16> to vector<8x8xbf16>
    %cst_36 = arith.constant dense<0.000000e+00> : vector<8x8xf32>
    %56 = tpu.matmul %51, %53, %cst_36 {dimension_numbers = #tpu.dot_dimension_numbers<[1], [1], [0], [0], [0, 0, 1, 0], [], []>} : vector<8x8xbf16>, vector<8x8xbf16>, vector<8x8xf32> -> vector<8x8xf32>
    %cst_37 = arith.constant dense<0xFF800000> : vector<8xf32>
    %57 = vector.multi_reduction <maximumf>, %56, %cst_37 [1] : vector<8x8xf32> to vector<8xf32>
    %58 = vector.shape_cast %57 : vector<8xf32> to vector<8x1xf32>
    %59 = vector.broadcast %58 : vector<8x1xf32> to vector<8x8xf32>
    %60 = arith.subf %56, %59 : vector<8x8xf32>
    %61 = math.exp %60 : vector<8x8xf32>
    %cst_38 = arith.constant dense<0.000000e+00> : vector<8xf32>
    %62 = vector.multi_reduction <add>, %61, %cst_38 [1] : vector<8x8xf32> to vector<8xf32>
    %63 = vector.shape_cast %62 : vector<8xf32> to vector<8x1xf32>
    %64 = tpu.reciprocal %63 {approx = true} : vector<8x1xf32> -> vector<8x1xf32>
    %65 = vector.broadcast %64 : vector<8x1xf32> to vector<8x8xf32>
    %66 = arith.mulf %61, %65 : vector<8x8xf32>
    %67 = arith.truncf %66 : vector<8x8xf32> to vector<8x8xbf16>
    %cst_39 = arith.constant dense<0.000000e+00> : vector<8x8xf32>
    %68 = tpu.matmul %67, %55, %cst_39 {dimension_numbers = #tpu.dot_dimension_numbers<[1], [0], [0], [1], [0, 0, 1, 1], [], []>} : vector<8x8xbf16>, vector<8x8xbf16>, vector<8x8xf32> -> vector<8x8xf32>
    %c0_40 = arith.constant 0 : index
    %c0_41 = arith.constant 0 : index
    %c24 = arith.constant 24 : index
    %69 = vector.load %arg6[%c0_40, %c0_41, %c24] : memref<1x8x96xbf16, #tpu.memory_space<vmem>>, vector<1x8x8xbf16>
    %70 = vector.shape_cast %69 : vector<1x8x8xbf16> to vector<8x8xbf16>
    %c0_42 = arith.constant 0 : index
    %c0_43 = arith.constant 0 : index
    %c56 = arith.constant 56 : index
    %71 = vector.load %arg6[%c0_42, %c0_43, %c56] : memref<1x8x96xbf16, #tpu.memory_space<vmem>>, vector<1x8x8xbf16>
    %72 = vector.shape_cast %71 : vector<1x8x8xbf16> to vector<8x8xbf16>
    %c0_44 = arith.constant 0 : index
    %c0_45 = arith.constant 0 : index
    %c88 = arith.constant 88 : index
    %73 = vector.load %arg6[%c0_44, %c0_45, %c88] : memref<1x8x96xbf16, #tpu.memory_space<vmem>>, vector<1x8x8xbf16>
    %74 = vector.shape_cast %73 : vector<1x8x8xbf16> to vector<8x8xbf16>
    %cst_46 = arith.constant dense<0.000000e+00> : vector<8x8xf32>
    %75 = tpu.matmul %70, %72, %cst_46 {dimension_numbers = #tpu.dot_dimension_numbers<[1], [1], [0], [0], [0, 0, 1, 0], [], []>} : vector<8x8xbf16>, vector<8x8xbf16>, vector<8x8xf32> -> vector<8x8xf32>
    %cst_47 = arith.constant dense<0xFF800000> : vector<8xf32>
    %76 = vector.multi_reduction <maximumf>, %75, %cst_47 [1] : vector<8x8xf32> to vector<8xf32>
    %77 = vector.shape_cast %76 : vector<8xf32> to vector<8x1xf32>
    %78 = vector.broadcast %77 : vector<8x1xf32> to vector<8x8xf32>
    %79 = arith.subf %75, %78 : vector<8x8xf32>
    %80 = math.exp %79 : vector<8x8xf32>
    %cst_48 = arith.constant dense<0.000000e+00> : vector<8xf32>
    %81 = vector.multi_reduction <add>, %80, %cst_48 [1] : vector<8x8xf32> to vector<8xf32>
    %82 = vector.shape_cast %81 : vector<8xf32> to vector<8x1xf32>
    %83 = tpu.reciprocal %82 {approx = true} : vector<8x1xf32> -> vector<8x1xf32>
    %84 = vector.broadcast %83 : vector<8x1xf32> to vector<8x8xf32>
    %85 = arith.mulf %80, %84 : vector<8x8xf32>
    %86 = arith.truncf %85 : vector<8x8xf32> to vector<8x8xbf16>
    %cst_49 = arith.constant dense<0.000000e+00> : vector<8x8xf32>
    %87 = tpu.matmul %86, %74, %cst_49 {dimension_numbers = #tpu.dot_dimension_numbers<[1], [0], [0], [1], [0, 0, 1, 1], [], []>} : vector<8x8xbf16>, vector<8x8xbf16>, vector<8x8xf32> -> vector<8x8xf32>
    %88 = tpu.concatenate %30, %49, %68, %87 in 1 : vector<8x8xf32>, vector<8x8xf32>, vector<8x8xf32>, vector<8x8xf32> -> vector<8x32xf32>
    %c0_50 = arith.constant 0 : index
    %c0_51 = arith.constant 0 : index
    %c0_52 = arith.constant 0 : index
    %89 = vector.load %arg5[%c0_50, %c0_51, %c0_52] : memref<1x8x32xf32, #tpu.memory_space<vmem>>, vector<1x8x32xf32>
    %90 = vector.shape_cast %89 : vector<1x8x32xf32> to vector<8x32xf32>
    %91 = vector.shape_cast %88 : vector<8x32xf32> to vector<1x8x32xf32>
    tpu.vector_store %arg5[%c0_50, %c0_51, %c0_52], %91 {strides = array<i32>} : memref<1x8x32xf32, #tpu.memory_space<vmem>>, vector<1x8x32xf32>,
    return
  }
  func.func @transform_0(%arg0: i32, %arg1: i32) -> (i32, i32, i32) {
    %c0_i32 = arith.constant 0 : i32
    %c0_i32_0 = arith.constant 0 : i32
    %c0_i32_1 = arith.constant 0 : i32
    return %arg0, %c0_i32, %c0_i32_0 : i32, i32, i32
  }
  func.func @transform_1(%arg0: i32, %arg1: i32) -> (i32, i32) {
    %c0_i32 = arith.constant 0 : i32
    %c0_i32_0 = arith.constant 0 : i32
    return %c0_i32, %arg1 : i32, i32
  }
  func.func @transform_2(%arg0: i32, %arg1: i32) -> (i32, i32) {
    %c0_i32 = arith.constant 0 : i32
    %c0_i32_0 = arith.constant 0 : i32
    return %c0_i32, %arg1 : i32, i32
  }
  func.func @transform_3(%arg0: i32, %arg1: i32) -> (i32, i32, i32) {
    %c0_i32 = arith.constant 0 : i32
    %c0_i32_0 = arith.constant 0 : i32
    return %arg0, %c0_i32, %arg1 : i32, i32, i32
  }
}

</mosaic_0001>

<bundles_post_ra>
// kernel: tpu_custom_call.1
= control target key start
LH: loop header
LB: loop body
LE: loop exit
PB: predicated region body
PF: predicated region fallthrough
CT: control target
= control target key end

     0   :  { %8 = vsyncpa [#allocation4], 0  ;;  %s1528_s0 = inlined_call_operand.hbm [shape: bf16[2,8,32], index: 0, kind: input, shape index: {}]   ;;  %s1529_s1 = inlined_call_operand.hbm [shape: bf16[32,96], index: 1, kind: input, shape index: {}]   ;;  %s1530_s2 = inlined_call_operand.vmem [shape: f32[1,96], index: 2, kind: input, shape index: {}]   ;;  %s1531_s3 = inlined_call_operand.hbm [shape: f32[2,8,32], index: 3, kind: output, shape index: {}]  }
   0x1   :  { %10 = vsyncpa [#allocation4 + $0x1], 0 }
   0x2   :  { %11 = vsyncpa [#allocation7], 0 }
   0x3   :  { %12 = vsyncpa [#allocation5], 0 }
   0x4   :  { %14 = vsyncpa [#allocation5 + $0x1], 0  ;;  %s1283_s12 = smov 0   ;;  %s1285_s13 = smov 0  }
   0x5   :  { %s1287_s14 = smov 0   ;;  %s1289_s15 = smov 0  }
   0x6   :  { %s1291_s16 = smov 0   ;;  %s1293_s17 = smov 0  }
   0x7 LB: > { %s888_s18 = sadd.s32 4294967295, %s1240_s17   ;;  %s889_s19 = sadd.s32 4294967294, %s1240_s17   ;;  %s1240_s17 = sphi %s1293_s17, %s20_s17   ;;  %s1236_s16 = sphi %s1291_s16, %s1549_s16   ;;  %s1232_s15 = sphi %s1289_s15, %s1548_s15   ;;  %s1228_s14 = sphi %s1287_s14, %s1547_s14   ;;  %s1224_s13 = sphi %s1285_s13, %s1546_s13   ;;  %s1220_s12 = sphi %s1283_s12, %s1545_s12  }
   0x8   : > { %p52_p0 = scmp.ne.s32.totalorder %s1224_s13, %s1220_s12  ;;  %p1317_p1 = scmp.eq.s32.totalorder %s888_s18, 0 }
   0x9   : > { %p1321_p2 = scmp.eq.s32.totalorder %s888_s18, 1  ;;  %p136_p3 = scmp.eq.s32.totalorder %s889_s19, 1 }
   0xa   : > { %p1327_p4 = por %p1317_p1, %p52_p0  ;;  %p890_p5 = scmp.ge.s32.totalorder %s1240_s17, 1 }
   0xb   : > { %p1332_p6 = por %p136_p3, %p52_p0  ;;  %p143_p7 = scmp.lt.s32.totalorder %s1240_s17, 3 }
   0xc   : > { %s1535_s22 = scalar_select %p1327_p4, 1, 0 }
   0xd   : > { %s1536_s23 = scalar_select %p1332_p6, 1, 0 }
   0xe   : > { %p1337_p8 = pnand %p890_p5, %p143_p7  ;;  %s1242_s25 = smov [#allocation6]  }
   0xf   : > { %s157_s26 = sshll.u32 %s1242_s25, 4  ;;  %s32_s28 = sadd.s32 1, %s1236_s16  ;;  %s158_s26 = int_to_ptr.vmem [resolvable:$true] %s157_s26 }
  0x10   : > { %p1000_p9 = pneg %p1337_p8  ;;  %s1113_s29 = scalar_lea.vmem %s158_s26, 256 }
  0x11   : > { %p1114_p13 = scmp.ne.s32.totalorder %s158_s26, %s1113_s29  ;;  %p1121_p5 = scmp.lt.s32.totalorder %s158_s26, %s158_s26 }
  0x12   : > { %p1346_p11 = pnand %p1000_p9, %p1317_p1  ;;  %p1122_p7 = scmp.lt.s32.totalorder %s1113_s29, %s1113_s29 }
  0x14   : > { %p1104_p12 = pneg %p1346_p11  ;;  %p1123_p6 = por %p1122_p7, %p1121_p5 }
  0x16   : > { %p1116_p0 = pnand %p1114_p13, %p1104_p12 }
  0x18   : > { %p1117_p3 = pneg %p1116_p0 }
  0x1a   : > { %p1124_p4 = pnand %p1123_p6, %p1117_p3 }
  0x1c   : > { %1127 = shalt.err (!%p1124_p4)
}
  0x1d   : > { %s1243_s30 = smov 64   ;;  %s1244_s4 = smov 4  }
  0x1e   : > { %1003 = dma.hbm_to_vmem [thread:$0]  (!%p1346_p11), %s1529_s1, 256, %s158_s26, [#allocation7], %s1243_s30, %s1243_s30, %s1244_s4  }
  0x1f   : > { %p34_p6 = scmp.ge.s32.totalorder %s32_s28, 2  ;;  %s39_s7 = sadd.s32 1, %s1228_s14 }
  0x20   : > { %p46_p4 = scmp.ne.s32.totalorder %s1228_s14, %s1224_s13  ;;  %p47_p9 = scmp.eq.s32.totalorder %s1240_s17, 0 }
  0x21   : > { %s1551_s28 = smov (%p34_p6, %s32_s28), 0  ;;  %p1013_p0 = scmp.lt.s32.totalorder %s1240_s17, 2 }
  0x22   : > { %p1364_p12 = por %p47_p9, %p46_p4  ;;  %p1370_p13 = por %p1321_p2, %p46_p4 }
  0x23   : > { %s36_s10 = ssub.s32 %s1236_s16, %s1551_s28  ;;  %s177_s11 = sand.u32 1, %s1228_s14  }
  0x24   : > { %p37_p11 = scmp.eq.s32.totalorder %s36_s10, 0  ;;  %s894_s18 = sshll.u32 %s177_s11, 2 }
  0x25   : > { %s895_s25 = sshll.u32 %s1236_s16, 6  ;;  %s181_s30 = scalar_lea.vmem [#allocation3], %s894_s18 }
  0x26   : > { %s1379_s19 = scalar_select %p37_p11, %s1228_s14, %s39_s7  }
  0x27   : > { %s186_s29 = scalar_lea.hbm %s1528_s0, %s895_s25  ;;  %s188_s4 = sshll.u32 %s181_s30, 4  ;;  %s189_s4 = int_to_ptr.vmem [resolvable:$true] %s188_s4 }
  0x28   : > { %p1387_p2 = pnand %p1013_p0, %p1364_p12  ;;  %s178_s5 = scalar_lea.sflag [#allocation4], %s177_s11 }
  0x29   : > { %s1141_s6 = scalar_lea.vmem %s189_s4, 64  ;;  %s1245_s7 = smov [#allocation3]  }
  0x2a   : > { %p1130_p3 = pneg %p1387_p2  ;;  %p1142_p5 = scmp.ne.s32.totalorder %s189_s4, %s1141_s6 }
  0x2b   : > { %s1146_s10 = sshll.u32 %s1245_s7, 4  ;;  %s1147_s10 = int_to_ptr.vmem [resolvable:$false] %s1146_s10 }
  0x2c   : > { %p1144_p7 = pnand %p1142_p5, %p1130_p3  ;;  %s1148_s25 = scalar_lea.vmem %s1147_s10, 128 }
  0x2d   : > { %p1149_p4 = scmp.lt.s32.totalorder %s189_s4, %s1147_s10  ;;  %p1150_p9 = scmp.lt.s32.totalorder %s1148_s25, %s1141_s6 }
  0x2e   : > { %p1145_p6 = pneg %p1144_p7 }
  0x2f   : > { %p1151_p11 = por %p1150_p9, %p1149_p4 }
  0x31   : > { %p1152_p10 = pnand %p1151_p11, %p1145_p6 }
  0x33   : > { %1155 = shalt.err (!%p1152_p10)
}
  0x34   : > { %1007 = dma.hbm_to_vmem [thread:$0]  (!%p1387_p2), %s186_s29, 64, %s189_s4, %s178_s5  }
  0x35   : > { %197 = sbr.rel (%p1337_p8) target bundleno = 1291 (0x50b), region = 32  ;;  %s1398_s8 = sand.u32 (!%p1337_p8), 1, %s1224_s13  }
  0x36   : > { %s897_s11 = sshll.u32 (!%p1337_p8), %s1398_s8, 2  ;;  %s200_s18 = scalar_lea.sflag (!%p1337_p8), [#allocation4], %s1398_s8 }
  0x37   : > { %s203_s26 = scalar_lea.vmem (!%p1337_p8), [#allocation3], %s897_s11  ;;  %p1542_p12 = scmp.ne.s32.totalorder (!%p1337_p8), %s1535_s22, 0 }
  0x3a   : > { %1207 = dma.done.wait (%p1542_p12), %s200_s18, 64  }
  0x3b   : > { %1209 = vsyncadd (%p1542_p12), %s200_s18, 4294967232 }
  0x3c   : > { %1211 = dma.done.wait (%p1317_p1), [#allocation7], 256  }
  0x3d   : > { %1213 = vsyncadd (%p1317_p1), [#allocation7], 4294967040  ;;  %v1246_v0 = vmov 0.0   ;;  %vm1247_vm0 = vmmov 0   ;;  %v1083_v1 = vld [vmem:[#allocation6 + $0x8] sm:$0xff]   ;;  %v1084_v2 = vld [vmem:[#allocation6] sm:$0xff]  }
  0x3e   : > { %936 = vmatprep.subr.bf16.mxu0 %v1246_v0  ;;  %940 = vmatprep.mubr.msk.bf16.mxu0 %vm1247_vm0, %v1246_v0  ;;  %v237_v3 = vld [vmem:[%s203_s26] sm:$0xf]  ;;  %vm261_vm1 = vcmask 261120   ;;  %v900_v4 = vld [vmem:[%s1530_s2] ss:$0 sm:$0xff]  ;;  %vm306_vm2 = vcmask 781312  }
  0x3f   : > { %944 = vmatprep.subr.bf16.mxu1 %v1246_v0  ;;  %946 = vmatprep.mubr.msk.bf16.mxu1 %vm1247_vm0, %v1246_v0  ;;  %s1248_s24 = smov 120   ;;  %s1249_s27 = smov 96   ;;  %vm314_vm3 = vcmask 64512   ;;  %vm378_vm4 = vcmask 1043456   ;;  %vm765_vm5 = vcmask 130048   ;;  %vm767_vm6 = vcmask 195584  }
  0x40   : > { %937 = vmatpush3.bf16.msra.mxu0 %v1083_v1  ;;  %s1250_s29 = smov 80   ;;  %s1251_s30 = smov 88  }
  0x41   : > { %938 = vmatprep.subr.bf16.mxu0 %v1246_v0  ;;  %s1252_s4 = smov 72   ;;  %s1253_s21 = smov 112  }
  0x42   : > { %s1254_s5 = smov 104   ;;  %s1255_s6 = smov 56  }
  0x43   : > { %s1256_s7 = smov 64   ;;  %s1257_s10 = smov 40  }
  0x44   : > { %939 = vmatpush3.bf16.msra.mxu0 %v1084_v2  ;;  %s1258_s25 = smov 48   ;;  %s1259_s11 = smov 8  }
  0x45   : > { %950 = vmatprep.subr.bf16.mxu0 %v1246_v0  ;;  %s1260_s18 = smov 16   ;;  %s1261_s26 = smov 24  }
  0x46   : > { %s899_s20 = sshll.u32 %s1398_s8, 3  ;;  %s914_s22 = sshll.u32 %s1232_s15, 7 }
  0x47   : > { %941 = vmatmul.mubr.msk.bf16.vlgmr.msra.gmra.mxu0 %vm261_vm1, %v237_v3  ;;  %s1262_s15 = smov [#allocation8]  }
  0x48   : > { %952 = vmatprep.mubr.msk.bf16.mxu0 %vm1247_vm0, %v1246_v0 }
 0x107   : > { %v299_v5 = vpop.f32.mrf.mxu0 }
 0x108   : > { %v300_v6 = vadd.f32 %v900_v4, %v299_v5 }
 0x109   : > { %v942_v7 = vpop.f32.mrf.mxu0 }
 0x10a   : > { %v305_v8 = vpack.c.bf16 %v300_v6, %v300_v6 }
 0x10b   : > { %v302_v9 = vpop.f32.mrf.mxu0 }
 0x10c   : > { %307 = vst.msk [vmem:[#allocation2] sm:$0xf] %vm306_vm2, %v305_v8 }
 0x10d   : > { %v943_v10 = vpop.f32.mrf.mxu0 }
 0x113   : > { %v308_v11 = vld [vmem:[#allocation2] sm:$0xf] }
 0x114   : > { %v1424_v12 = vcombine.low %v308_v11, %v308_v11 }
 0x116   : > { %422 = vrot.lane.b32.xlu1 %v1424_v12, %s1248_s24  ;;  %312 = vrot.lane.b32.xlu0 %v1424_v12, %s1249_s27  ;;  %s232_s24 = scalar_lea.vmem [#allocation8], %s899_s20 }
 0x117   : > { %s785_s27 = sshll.u32 %s232_s24, 4  ;;  %s786_s27 = int_to_ptr.vmem [resolvable:$true] %s785_s27 }
 0x11a   : > { %534 = vrot.lane.b32.xlu1 %v1424_v12, %s1250_s29  ;;  %424 = vrot.lane.b32.xlu0 %v1424_v12, %s1251_s30 }
 0x11e   : > { %644 = vrot.lane.b32.xlu1 %v1424_v12, %s1252_s4  ;;  %532 = vrot.lane.b32.xlu0 %v1424_v12, %s1253_s21  ;;  %s1485_s4 = scalar_lea.hbm %s1531_s3, %s914_s22  ;;  %s771_s21 = scalar_lea.sflag [#allocation5], %s1398_s8 }
 0x122   : > { %642 = vrot.lane.b32.xlu0 %v1424_v12, %s1254_s5  ;;  %s1156_s5 = scalar_lea.vmem %s786_s27, 128 }
 0x123   : > { %p1157_p1 = scmp.ne.s32.totalorder %s786_s27, %s1156_s5 }
 0x125   : > { %p1158_p8 = pnand %p1157_p1, %p1370_p13 }
 0x127   : > { %p1159_p10 = pneg %p1158_p8 }
 0x188   : > { %v313_v13 = vpop.permute.xlu0 %312  ;;  %v423_v16 = vpop.permute.xlu1 %422 }
 0x189   : > { %v319_v14 = vsel %vm314_vm3, %v313_v13, 0 }
 0x18a   : > { %945 = vmatpush3.bf16.xpose.msra.mxu1 %v319_v14 }
 0x18b   : > { %956 = vmatprep.subr.bf16.mxu1 %v1246_v0 }
 0x18c   : > { %v425_v15 = vpop.permute.xlu0 %424  ;;  %v535_v18 = vpop.permute.xlu1 %534 }
 0x18d   : > { %v430_v17 = vsel %vm314_vm3, %v425_v15, 0  ;;  %v540_v19 = vsel %vm314_vm3, %v535_v18, 0 }
 0x190   : > { %v645_v20 = vpop.permute.xlu1 %644  ;;  %v533_v21 = vpop.permute.xlu0 %532 }
 0x191   : > { %947 = vmatmul.mubr.msk.bf16.vlgmr.msra.gmra.mxu1 %vm314_vm3, %v308_v11  ;;  %v650_v22 = vsel %vm314_vm3, %v645_v20, 0 }
 0x192   : > { %957 = vmatpush3.bf16.xpose.msra.mxu1 %v430_v17  ;;  %958 = vmatprep.mubr.msk.bf16.mxu1 %vm1247_vm0, %v1246_v0 }
 0x193   : > { %968 = vmatprep.subr.bf16.mxu1 %v1246_v0 }
 0x194   : > { %v643_v23 = vpop.permute.xlu0 %642 }
 0x199   : > { %959 = vmatmul.mubr.msk.bf16.vlgmr.msra.gmra.mxu1 %vm314_vm3, %v423_v16 }
 0x19a   : > { %969 = vmatpush3.bf16.xpose.msra.mxu1 %v540_v19  ;;  %970 = vmatprep.mubr.msk.bf16.mxu1 %vm1247_vm0, %v1246_v0 }
 0x19b   : > { %980 = vmatprep.subr.bf16.mxu1 %v1246_v0 }
 0x1a1   : > { %971 = vmatmul.mubr.msk.bf16.vlgmr.msra.gmra.mxu1 %vm314_vm3, %v533_v21 }
 0x1a2   : > { %981 = vmatpush3.bf16.xpose.msra.mxu1 %v650_v22  ;;  %982 = vmatprep.mubr.msk.bf16.mxu1 %vm1247_vm0, %v1246_v0 }
 0x1a9   : > { %983 = vmatmul.mubr.msk.bf16.vlgmr.msra.gmra.mxu1 %vm314_vm3, %v643_v23 }
 0x251   : > { %v355_v24 = vpop.f32.mrf.mxu1 }
 0x252   : > { %v361_v25 = vsel %vm314_vm3, %v355_v24, -inf }
 0x253   : > { %362 = vmax.xlane.f32.xlu1 %v361_v25  ;;  %v948_v26 = vpop.f32.mrf.mxu1 }
 0x255   : > { %v358_v27 = vpop.f32.mrf.mxu1 }
 0x257   : > { %v949_v28 = vpop.f32.mrf.mxu1 }
 0x259   : > { %v466_v29 = vpop.f32.mrf.mxu1 }
 0x25a   : > { %v472_v30 = vsel %vm314_vm3, %v466_v29, -inf }
 0x25b   : > { %473 = vmax.xlane.f32.xlu0 %v472_v30  ;;  %v960_v31 = vpop.f32.mrf.mxu1 }
 0x25d   : > { %v469_v32 = vpop.f32.mrf.mxu1 }
 0x25f   : > { %v961_v33 = vpop.f32.mrf.mxu1 }
 0x261   : > { %v576_v34 = vpop.f32.mrf.mxu1 }
 0x262   : > { %v582_v35 = vsel %vm314_vm3, %v576_v34, -inf }
 0x263   : > { %583 = vmax.xlane.f32.xlu0 %v582_v35  ;;  %v972_v36 = vpop.f32.mrf.mxu1 }
 0x265   : > { %v579_v37 = vpop.f32.mrf.mxu1 }
 0x267   : > { %v973_v38 = vpop.f32.mrf.mxu1 }
 0x269   : > { %v686_v39 = vpop.f32.mrf.mxu1 }
 0x26a   : > { %v692_v40 = vsel %vm314_vm3, %v686_v39, -inf }
 0x26b   : > { %693 = vmax.xlane.f32.xlu1 %v692_v40  ;;  %v984_v41 = vpop.f32.mrf.mxu1 }
 0x26d   : > { %v689_v42 = vpop.f32.mrf.mxu1 }
 0x26f   : > { %v985_v43 = vpop.f32.mrf.mxu1 }
 0x2dc   : > { %v363_v44 = vpop.xlane.xlu1 %362 }
 0x2dd   : > { %v364_v45 = vsub.f32 %v355_v24, %v363_v44 }
 0x2df   : > { %v365_v46 = vmul.f32 1.442695, %v364_v45 }
 0x2e1   : > { %1086 = vpow2.f32 %v365_v46 }
 0x2e4   : > { %v474_v47 = vpop.xlane.xlu0 %473 }
 0x2e5   : > { %v475_v48 = vsub.f32 %v466_v29, %v474_v47 }
 0x2e7   : > { %v476_v49 = vmul.f32 1.442695, %v475_v48 }
 0x2e9   : > { %1088 = vpow2.f32 %v476_v49 }
 0x2ec   : > { %v584_v50 = vpop.xlane.xlu0 %583 }
 0x2ed   : > { %v585_v51 = vsub.f32 %v576_v34, %v584_v50 }
 0x2ee   : > { %v1087_v52 = vpop.eup %1086 }
 0x2ef   : > { %v586_v53 = vmul.f32 1.442695, %v585_v51  ;;  %v367_v54 = vsel %vm314_vm3, %v1087_v52, 0.0 }
 0x2f0   : > { %368 = vadd.xlane.f32.xlu0 %v367_v54 }
 0x2f1   : > { %1090 = vpow2.f32 %v586_v53 }
 0x2f4   : > { %v694_v59 = vpop.xlane.xlu1 %693 }
 0x2f5   : > { %v695_v60 = vsub.f32 %v686_v39, %v694_v59 }
 0x2f6   : > { %v1089_v55 = vpop.eup %1088 }
 0x2f7   : > { %v478_v56 = vsel %vm314_vm3, %v1089_v55, 0.0  ;;  %v696_v61 = vmul.f32 1.442695, %v695_v60 }
 0x2f8   : > { %479 = vadd.xlane.f32.xlu1 %v478_v56 }
 0x2f9   : > { %1092 = vpow2.f32 %v696_v61 }
 0x2fe   : > { %v1091_v57 = vpop.eup %1090 }
 0x2ff   : > { %v588_v58 = vsel %vm314_vm3, %v1091_v57, 0.0 }
 0x300   : > { %589 = vadd.xlane.f32.xlu0 %v588_v58 }
 0x306   : > { %v1093_v62 = vpop.eup %1092 }
 0x307   : > { %v698_v63 = vsel %vm314_vm3, %v1093_v62, 0.0 }
 0x309   : > { %484 = vrot.lane.b32.xlu1 %v1424_v12, %s1255_s6  ;;  %s1160_s6 = sshll.u32 %s1262_s15, 4  ;;  %s1161_s6 = int_to_ptr.vmem [resolvable:$false] %s1160_s6 }
 0x30a   : > { %p1163_p0 = scmp.lt.s32.totalorder %s786_s27, %s1161_s6 }
 0x316   : > { %373 = vrot.lane.b32.xlu0 %v1424_v12, %s1256_s7  ;;  %s1162_s7 = scalar_lea.vmem %s1161_s6, 256 }
 0x317   : > { %p1164_p2 = scmp.lt.s32.totalorder %s1162_s7, %s1156_s5 }
 0x319   : > { %p1165_p3 = por %p1164_p2, %p1163_p0 }
 0x31a   : > { %704 = vrot.lane.b32.xlu0 %v1424_v12, %s1257_s10 }
 0x31b   : > { %p1166_p5 = pnand %p1165_p3, %p1159_p10 }
 0x32d   : > { %699 = vadd.xlane.f32.xlu1 %v698_v63 }
 0x33e   : > { %594 = vrot.lane.b32.xlu1 %v1424_v12, %s1258_s25 }
 0x379   : > { %v369_v1 = vpop.xlane.xlu0 %368 }
 0x37a   : > { %1094 = vrcp.f32 %v369_v1 }
 0x381   : > { %v480_v2 = vpop.xlane.xlu1 %479 }
 0x382   : > { %1096 = vrcp.f32 %v480_v2 }
 0x385   : > { %v485_v8 = vpop.permute.xlu1 %484 }
 0x386   : > { %v490_v11 = vsel %vm378_vm4, %v485_v8, 0 }
 0x387   : > { %v1095_v3 = vpop.eup %1094 }
 0x388   : > { %v371_v5 = vmul.f32 %v1095_v3, %v1087_v52 }
 0x389   : > { %v590_v4 = vpop.xlane.xlu0 %589 }
 0x38a   : > { %v372_v9 = vpack.c.bf16 %v371_v5, %v371_v5  ;;  %1098 = vrcp.f32 %v590_v4 }
 0x38d   : > { %v374_v6 = vpop.permute.xlu0 %373 }
 0x38e   : > { %v380_v7 = vsel %vm378_vm4, %v374_v6, 0 }
 0x38f   : > { %951 = vmatpush3.bf16.msra.mxu0 %v380_v7  ;;  %v1097_v10 = vpop.eup %1096 }
 0x390   : > { %962 = vmatprep.subr.bf16.mxu0 %v1246_v0  ;;  %v482_v12 = vmul.f32 %v1097_v10, %v1089_v55 }
 0x391   : > { %v705_v19 = vpop.permute.xlu0 %704 }
 0x392   : > { %953 = vmatmul.mubr.msk.bf16.vlgmr.msra.gmra.mxu0 %vm314_vm3, %v372_v9  ;;  %v483_v13 = vpack.c.bf16 %v482_v12, %v482_v12  ;;  %v710_v21 = vsel %vm378_vm4, %v705_v19, 0 }
 0x393   : > { %963 = vmatpush3.bf16.msra.mxu0 %v490_v11  ;;  %964 = vmatprep.mubr.msk.bf16.mxu0 %vm1247_vm0, %v1246_v0 }
 0x394   : > { %974 = vmatprep.subr.bf16.mxu0 %v1246_v0 }
 0x397   : > { %v1099_v14 = vpop.eup %1098 }
 0x398   : > { %v592_v16 = vmul.f32 %v1099_v14, %v1091_v57 }
 0x39a   : > { %965 = vmatmul.mubr.msk.bf16.vlgmr.msra.gmra.mxu0 %vm314_vm3, %v483_v13  ;;  %v593_v20 = vpack.c.bf16 %v592_v16, %v592_v16 }
 0x39b   : > { %976 = vmatprep.mubr.msk.bf16.mxu0 %vm1247_vm0, %v1246_v0 }
 0x3b6   : > { %v700_v15 = vpop.xlane.xlu1 %699 }
 0x3b7   : > { %1100 = vrcp.f32 %v700_v15 }
 0x3ba   : > { %v595_v17 = vpop.permute.xlu1 %594 }
 0x3bb   : > { %v600_v18 = vsel %vm378_vm4, %v595_v17, 0 }
 0x3bc   : > { %975 = vmatpush3.bf16.msra.mxu0 %v600_v18 }
 0x3bd   : > { %986 = vmatprep.subr.bf16.mxu0 %v1246_v0 }
 0x3bf   : > { %977 = vmatmul.mubr.msk.bf16.vlgmr.msra.gmra.mxu0 %vm314_vm3, %v593_v20 }
 0x3c0   : > { %987 = vmatpush3.bf16.msra.mxu0 %v710_v21  ;;  %988 = vmatprep.mubr.msk.bf16.mxu0 %vm1247_vm0, %v1246_v0 }
 0x3c4   : > { %v1101_v22 = vpop.eup %1100 }
 0x3c5   : > { %v702_v23 = vmul.f32 %v1101_v22, %v1093_v62 }
 0x3c7   : > { %v703_v24 = vpack.c.bf16 %v702_v23, %v702_v23 }
 0x3c9   : > { %989 = vmatmul.mubr.msk.bf16.vlgmr.msra.gmra.mxu0 %vm314_vm3, %v703_v24 }
 0x452   : > { %v416_v25 = vpop.f32.mrf.mxu0 }
 0x454   : > { %v954_v26 = vpop.f32.mrf.mxu0 }
 0x456   : > { %v419_v27 = vpop.f32.mrf.mxu0 }
 0x458   : > { %v955_v28 = vpop.f32.mrf.mxu0 }
 0x45a   : > { %v526_v29 = vpop.f32.mrf.mxu0 }
 0x45b   : > { %753 = vrot.lane.b32.xlu1 %v526_v29, %s1259_s11 }
 0x45c   : > { %v966_v30 = vpop.f32.mrf.mxu0 }
 0x45e   : > { %v529_v31 = vpop.f32.mrf.mxu0 }
 0x460   : > { %v967_v32 = vpop.f32.mrf.mxu0 }
 0x47f   : > { %v636_v33 = vpop.f32.mrf.mxu0 }
 0x480   : > { %757 = vrot.lane.b32.xlu0 %v636_v33, %s1260_s18 }
 0x481   : > { %v978_v0 = vpop.f32.mrf.mxu0 }
 0x483   : > { %v639_v34 = vpop.f32.mrf.mxu0 }
 0x485   : > { %v979_v35 = vpop.f32.mrf.mxu0 }
 0x489   : > { %v746_v36 = vpop.f32.mrf.mxu0 }
 0x48a   : > { %761 = vrot.lane.b32.xlu1 %v746_v36, %s1261_s26 }
 0x48b   : > { %v990_v37 = vpop.f32.mrf.mxu0 }
 0x48d   : > { %v749_v38 = vpop.f32.mrf.mxu0 }
 0x48f   : > { %v991_v39 = vpop.f32.mrf.mxu0 }
 0x4cd   : > { %v754_v40 = vpop.permute.xlu1 %753 }
 0x4ce   : > { %v764_v42 = vsel %vm314_vm3, %v416_v25, %v754_v40 }
 0x4f2   : > { %v758_v41 = vpop.permute.xlu0 %757 }
 0x4f3   : > { %v766_v43 = vsel %vm765_vm5, %v764_v42, %v758_v41 }
 0x4fc   : > { %v762_v44 = vpop.permute.xlu1 %761 }
 0x4fd   : > { %v768_v45 = vsel %vm767_vm6, %v766_v43, %v762_v44 }
 0x4fe   : > { %769 = vst.msk [vmem:[%s232_s24] sm:$0xff] %vm261_vm1, %v768_v45 }
 0x4ff   : > { %1169 = shalt.err (!%p1166_p5)
}
 0x500   : > { %s1170_s10 = scalar_lea.hbm %s1485_s4, 128  ;;  %s1174_s11 = scalar_lea.hbm %s1531_s3, 256 }
 0x501   : > { %p1171_p7 = scmp.ne.s32.totalorder %s1485_s4, %s1170_s10  ;;  %p1175_p9 = scmp.lt.s32.totalorder %s1485_s4, %s1531_s3 }
 0x502   : > { %p1176_p11 = scmp.lt.s32.totalorder %s1174_s11, %s1170_s10 }
 0x503   : > { %p1172_p6 = pnand %p1171_p7, %p1370_p13 }
 0x504   : > { %p1177_p12 = por %p1176_p11, %p1175_p9 }
 0x505   : > { %p1173_p4 = pneg %p1172_p6 }
 0x507   : > { %p1178_p1 = pnand %p1177_p12, %p1173_p4 }
 0x509   : > { %1181 = shalt.err (!%p1178_p1)
}
 0x50a   : > { %998 = dma.vmem_to_hbm [thread:$0]  (%p1370_p13), %s786_s27, 128, %s1485_s4, %s771_s21  }
 0x50b PF: > { %s797_s20 = sand.u32 1, %s1220_s12   ;;  %p1543_p8 = scmp.ne.s32.totalorder %s1536_s23, 0 }
 0x50c   : > { %p1544_p10 = scmp.ge.s32.totalorder %s1240_s17, 2  ;;  %s798_s22 = scalar_lea.sflag [#allocation5], %s797_s20 }
 0x50e   : > { %p1009_p0 = pnand %p1544_p10, %p1543_p8 }
 0x510   : > { %p1010_p2 = pneg %p1009_p0 }
 0x512   : > { %1215 = dma.done.wait (%p1010_p2), %s798_s22, 128  }
 0x513   : > { %1217 = vsyncadd (%p1010_p2), %s798_s22, 4294967168  ;;  %s20_s17 = sadd.s32 1, %s1240_s17   ;;  %s1545_s12 = smov %s1224_s13 }
 0x514   : > { %p17_p3 = scmp.ge.s32.totalorder %s20_s17, 4   ;;  %s1546_s13 = smov %s1228_s14 }
 0x515   : > { %s1547_s14 = smov %s1379_s19  ;;  %s1548_s15 = smov %s1236_s16 }
 0x516   : > { %s1549_s16 = smov %s1551_s28  ;;  %19 = sbr.rel (!%p17_p3) target bundleno = 7 (0x7), region = 85 }
 0x51b   :  { %803 = vsyncpa [#allocation4], 1 }
 0x51c   :  { %805 = vsyncpa [#allocation4 + $0x1], 1 }
 0x51d   :  { %806 = vsyncpa [#allocation7], 1 }
 0x51e   :  { %807 = vsyncpa [#allocation5], 1 }
 0x51f   :  { %809 = vsyncpa [#allocation5 + $0x1], 1 }

</bundles_post_ra>
